<compile_context>
chip_gen: v7x
topology: tpu7x:2x2x1
jax: 0.10.0
libtpu: 0.0.40
codegen_flags: <defaults>
</compile_context>

<pallas_src>
import functools

import jax
import jax.numpy as jnp
from jax import lax
from jax.experimental import pallas as pl
from jax.experimental.pallas import tpu as pltpu


def duration_predictor_kernel(x_ref, m_ref,
                              w1_ref, b1_ref, g1_ref, be1_ref,
                              w2_ref, b2_ref, g2_ref, be2_ref,
                              wp_ref, bp_ref,
                              o_ref,
                              *, kernel_size, out_t, matmul_dtype):
    """One batch element per grid step; data is (C, T) with T on the lane axis."""
    k = kernel_size
    pad = k // 2
    T = out_t
    Tp = T + 2 * pad                  # conv1 output width (T plus halo for conv2)

    x = x_ref[0]                      # (Cin, T + 4*pad)  matmul_dtype
    m_q = m_ref[0]                    # (1,   T + 4*pad)  f32

    def conv_relu_ln(inp, w_ref, b_ref, g_ref, be_ref, width):
        """inp: (C, width + 2*pad), masked & zero-padded, matmul_dtype.
        k accumulated (Cout, C) @ (C, width) MXU dots (f32 accumulation),
        then bias, ReLU and one-pass channel LayerNorm.  Returns f32."""
        acc = jnp.dot(w_ref[0], inp[:, 0:width],
                      preferred_element_type=jnp.float32)
        for j in range(1, k):
            acc = acc + jnp.dot(w_ref[j], inp[:, j:j + width],
                                preferred_element_type=jnp.float32)
        hc = jnp.maximum(acc + b_ref[...], 0.0)           # bias + ReLU (f32)
        # One-pass LayerNorm over channels (sublane axis); stats are (1, width).
        inv_c = 1.0 / hc.shape[0]
        s = jnp.sum(hc, axis=0, keepdims=True)
        ss = jnp.sum(hc * hc, axis=0, keepdims=True)
        mu = s * inv_c
        var = jnp.maximum(ss * inv_c - mu * mu, 0.0)      # guard tiny negatives
        return (hc - mu) * lax.rsqrt(var + 1e-5) * g_ref[...] + be_ref[...]

    # conv_1 -> relu -> norm_1, computed over T + 2*pad columns so conv_2's
    # taps stay in-block; the halo columns are zeroed by the mask just below.
    xm = (x * m_q).astype(matmul_dtype)                   # (Cin, T + 4*pad)
    h1 = conv_relu_ln(xm, w1_ref, b1_ref, g1_ref, be1_ref, Tp)
    # dropout: identity (eval mode).

    # conv_2 -> relu -> norm_2
    m_p = m_q[:, pad:pad + Tp]                            # (1, Tp)
    h1m = (h1 * m_p).astype(matmul_dtype)                 # (Cf, Tp)
    h2 = conv_relu_ln(h1m, w2_ref, b2_ref, g2_ref, be2_ref, T)
    # dropout: identity (eval mode).

    # 1x1 projection: VPU multiply + channel (sublane) reduction.  The pre-proj
    # mask multiply is folded into the final mask (mask is binary).
    m_c = m_q[:, 2 * pad:2 * pad + T]                     # (1, T)
    y = jnp.sum(h2 * wp_ref[...], axis=0, keepdims=True) + bp_ref[...]
    o_ref[0] = (y * m_c).astype(o_ref.dtype)              # lane-dense (1, T)


def duration_predictor(x_bct, mask_b1t, params, *, kernel_size,
                       matmul_dtype=jnp.bfloat16):
    """x_bct: (B, Cin, T); mask_b1t: (B, 1, T).  Returns (B, 1, T) float32.

    `params` is the output of prepare_params (all f32).  matmul_dtype controls
    only the MXU operand dtype (f32 accumulation either way); bfloat16 is the
    fast path, pass jnp.float32 for bit-faithful validation.
    """
    assert kernel_size % 2 == 1, (
        "only odd kernel_size matches PyTorch Conv1d(padding=k//2) 'same' output")
    B, Cin, T = x_bct.shape
    pad = kernel_size // 2
    halo = 2 * pad
    Tq = T + 2 * halo

    (w1, b1, g1, be1, w2, b2, g2, be2, wp, bp) = params
    Cf = w1.shape[1]

    # MXU operands in matmul_dtype; LN / bias / proj vectors stay f32.
    w1 = w1.astype(matmul_dtype)
    w2 = w2.astype(matmul_dtype)
    x_pad = jnp.pad(x_bct.astype(matmul_dtype), ((0, 0), (0, 0), (halo, halo)))
    m_pad = jnp.pad(mask_b1t.astype(jnp.float32), ((0, 0), (0, 0), (halo, halo)))

    kern = functools.partial(duration_predictor_kernel,
                             kernel_size=kernel_size, out_t=T,
                             matmul_dtype=matmul_dtype)

    def full(a):
        nd = a.ndim
        return pl.BlockSpec(a.shape, lambda b, _nd=nd: (0,) * _nd)

    kparams = (w1, b1, g1, be1, w2, b2, g2, be2, wp, bp)

    flops = (2 * B * kernel_size * (Cin * Cf * (T + 2 * pad) + Cf * Cf * T)
             + 2 * B * Cf * T)
    bytes_accessed = (int(x_pad.size) * x_pad.dtype.itemsize
                      + int(m_pad.size) * 4
                      + sum(int(p.size) * p.dtype.itemsize for p in kparams)
                      + B * T * 4)
    cost = pl.CostEstimate(flops=int(flops),
                           transcendentals=int(B * (2 * T + 2 * pad)),
                           bytes_accessed=int(bytes_accessed))

    out = pl.pallas_call(
        kern,
        out_shape=jax.ShapeDtypeStruct((B, 1, T), jnp.float32),
        grid_spec=pltpu.PrefetchScalarGridSpec(
            num_scalar_prefetch=0,
            grid=(B,),
            in_specs=[
                pl.BlockSpec((1, Cin, Tq), lambda b: (b, 0, 0)),   # x (padded)
                pl.BlockSpec((1, 1, Tq),   lambda b: (b, 0, 0)),   # mask (padded)
                full(w1), full(b1), full(g1), full(be1),
                full(w2), full(b2), full(g2), full(be2),
                full(wp), full(bp),
            ],
            out_specs=pl.BlockSpec((1, 1, T), lambda b: (b, 0, 0)),
        ),
        compiler_params=pltpu.CompilerParams(
            dimension_semantics=("parallel",),
            vmem_limit_bytes=48 * 1024 * 1024),   # leaves headroom on v7x (64 MiB)
        cost_estimate=cost,
    )(x_pad, m_pad, *kparams)
    return out


def prepare_params(pt_params):
    """PyTorch-shaped weights -> kernel layout (all f32; wrapper casts MXU operands).

    PyTorch shapes:
      conv.weight (Cout, Cin, K), conv.bias (Cout,)
      LayerNorm gamma/beta (C,)
      proj.weight (1, Cf, 1), proj.bias (1,)
    Kernel layout:
      conv weight (K, Cout, Cin) (tap-major), vectors as (C, 1) columns,
      proj weight (Cf, 1), proj bias (1, 1).
    """
    (w1, b1, g1, be1, w2, b2, g2, be2, wp, bp) = pt_params
    tap_major = lambda w: jnp.transpose(jnp.asarray(w, jnp.float32), (2, 0, 1))
    col = lambda v: jnp.asarray(v, jnp.float32).reshape(-1, 1)
    return (tap_major(w1), col(b1), col(g1), col(be1),
            tap_major(w2), col(b2), col(g2), col(be2),
            col(wp[0, :, 0]), col(bp))


def _reference(x_bct, mask_b1t, pt_params, kernel_size):
    """Pure-JAX reference of the PyTorch forward (eval mode)."""
    (w1, b1, g1, be1, w2, b2, g2, be2, wp, bp) = pt_params
    pad = kernel_size // 2

    def conv1d(h, w, b, p):
        out = lax.conv_general_dilated(
            h, w, window_strides=(1,), padding=[(p, p)],
            dimension_numbers=("NCH", "OIH", "NCH"))
        return out + b[None, :, None]

    def ln(h, g, be, eps=1e-5):
        mu = jnp.mean(h, axis=1, keepdims=True)
        var = jnp.mean((h - mu) ** 2, axis=1, keepdims=True)
        return (h - mu) * lax.rsqrt(var + eps) * g[None, :, None] + be[None, :, None]

    h = ln(jax.nn.relu(conv1d(x_bct * mask_b1t, w1, b1, pad)), g1, be1)
    h = ln(jax.nn.relu(conv1d(h * mask_b1t, w2, b2, pad)), g2, be2)
    y = conv1d(h * mask_b1t, wp, bp, 0)
    return y * mask_b1t


if __name__ == "__main__":
    # Small shapes consistent with the module (in=filter=32, K=3, T=16, B=2).
    B, Cin, Cf, T, K = 2, 32, 32, 16, 3

    key = jax.random.PRNGKey(0)
    keys = jax.random.split(key, 10)

    # PyTorch-shaped parameters.
    w1 = 0.1 * jax.random.normal(keys[0], (Cf, Cin, K), jnp.float32)
    b1 = 0.1 * jax.random.normal(keys[1], (Cf,), jnp.float32)
    w2 = 0.1 * jax.random.normal(keys[2], (Cf, Cf, K), jnp.float32)
    b2 = 0.1 * jax.random.normal(keys[3], (Cf,), jnp.float32)
    wp = 0.1 * jax.random.normal(keys[4], (1, Cf, 1), jnp.float32)
    bp = 0.1 * jax.random.normal(keys[5], (1,), jnp.float32)
    g1 = 1.0 + 0.05 * jax.random.normal(keys[7], (Cf,), jnp.float32)
    be1 = 0.05 * jax.random.normal(keys[8], (Cf,), jnp.float32)
    g2 = 1.0 + 0.05 * jax.random.normal(keys[9], (Cf,), jnp.float32)
    be2 = jnp.zeros((Cf,), jnp.float32)

    pt_params = (w1, b1, g1, be1, w2, b2, g2, be2, wp, bp)
    params = prepare_params(pt_params)

    # Inputs in PyTorch NCT layout: x (B, Cin, T), mask (B, 1, T).
    x = jax.random.normal(keys[6], (B, Cin, T), jnp.float32)
    lengths = jnp.array([T, T - 4])
    mask = (jnp.arange(T)[None, None, :] < lengths[:, None, None]).astype(jnp.float32)

    ref = _reference(x, mask, pt_params, K)

    # Default fast path: bf16 MXU operands, f32 accumulation.
    out = duration_predictor(x, mask, params, kernel_size=K)
    out = jax.block_until_ready(out)
    assert out.shape == (B, 1, T)
    err_bf16 = float(jnp.max(jnp.abs(out - ref)))
    assert err_bf16 < 1e-1, f"bf16-path mismatch vs reference: {err_bf16}"

    # f32 MXU path: must match the PyTorch-equivalent reference tightly.
    out_f32 = jax.block_until_ready(
        duration_predictor(x, mask, params, kernel_size=K,
                           matmul_dtype=jnp.float32))
    err_f32 = float(jnp.max(jnp.abs(out_f32 - ref)))
    assert err_f32 < 1e-5, f"f32-path mismatch vs reference: {err_f32}"

    print("KERNEL_OK")
</pallas_src>

<mosaic_0001>
module attributes {stable_mosaic.version = 11 : i64} {
  func.func @duration_predictor_kernel(%arg0: i32, %arg1: memref<1x32x20xbf16, #tpu.memory_space<vmem>>, %arg2: memref<1x1x20xf32, #tpu.memory_space<vmem>>, %arg3: memref<3x32x32xbf16, #tpu.memory_space<vmem>>, %arg4: memref<32x1xf32, #tpu.memory_space<vmem>>, %arg5: memref<32x1xf32, #tpu.memory_space<vmem>>, %arg6: memref<32x1xf32, #tpu.memory_space<vmem>>, %arg7: memref<3x32x32xbf16, #tpu.memory_space<vmem>>, %arg8: memref<32x1xf32, #tpu.memory_space<vmem>>, %arg9: memref<32x1xf32, #tpu.memory_space<vmem>>, %arg10: memref<32x1xf32, #tpu.memory_space<vmem>>, %arg11: memref<32x1xf32, #tpu.memory_space<vmem>>, %arg12: memref<1x1xf32, #tpu.memory_space<vmem>>, %arg13: memref<1x1x16xf32, #tpu.memory_space<vmem>>) attributes {dimension_semantics = [#tpu.dimension_semantics<parallel>], iteration_bounds = array<i64: 2>, scalar_prefetch = 0 : i64, scratch_operands = 0 : i64, tpu.core_type = #tpu.core_type<tc>, window_params = [{transform_indices = @transform_0, window_bounds = array<i64: 1, 32, 20>}, {transform_indices = @transform_1, window_bounds = array<i64: 1, 1, 20>}, {pipeline_mode = #tpu.pipeline_mode<synchronous>, transform_indices = @transform_2, window_bounds = array<i64: 3, 32, 32>}, {pipeline_mode = #tpu.pipeline_mode<synchronous>, transform_indices = @transform_3, window_bounds = array<i64: 32, 1>}, {pipeline_mode = #tpu.pipeline_mode<synchronous>, transform_indices = @transform_4, window_bounds = array<i64: 32, 1>}, {pipeline_mode = #tpu.pipeline_mode<synchronous>, transform_indices = @transform_5, window_bounds = array<i64: 32, 1>}, {pipeline_mode = #tpu.pipeline_mode<synchronous>, transform_indices = @transform_6, window_bounds = array<i64: 3, 32, 32>}, {pipeline_mode = #tpu.pipeline_mode<synchronous>, transform_indices = @transform_7, window_bounds = array<i64: 32, 1>}, {pipeline_mode = #tpu.pipeline_mode<synchronous>, transform_indices = @transform_8, window_bounds = array<i64: 32, 1>}, {pipeline_mode = #tpu.pipeline_mode<synchronous>, transform_indices = @transform_9, window_bounds = array<i64: 32, 1>}, {pipeline_mode = #tpu.pipeline_mode<synchronous>, transform_indices = @transform_10, window_bounds = array<i64: 32, 1>}, {pipeline_mode = #tpu.pipeline_mode<synchronous>, transform_indices = @transform_11, window_bounds = array<i64: 1, 1>}, {transform_indices = @transform_12, window_bounds = array<i64: 1, 1, 16>}]} {
    %c0 = arith.constant 0 : index
    %c0_0 = arith.constant 0 : index
    %c0_1 = arith.constant 0 : index
    %0 = vector.load %arg1[%c0, %c0_0, %c0_1] : memref<1x32x20xbf16, #tpu.memory_space<vmem>>, vector<1x32x20xbf16>
    %1 = vector.shape_cast %0 : vector<1x32x20xbf16> to vector<32x20xbf16>
    %c0_2 = arith.constant 0 : index
    %c0_3 = arith.constant 0 : index
    %c0_4 = arith.constant 0 : index
    %2 = vector.load %arg2[%c0_2, %c0_3, %c0_4] : memref<1x1x20xf32, #tpu.memory_space<vmem>>, vector<1x1x20xf32>
    %3 = vector.shape_cast %2 : vector<1x1x20xf32> to vector<1x20xf32>
    %4 = arith.extf %1 : vector<32x20xbf16> to vector<32x20xf32>
    %5 = vector.broadcast %3 : vector<1x20xf32> to vector<32x20xf32>
    %6 = arith.mulf %4, %5 : vector<32x20xf32>
    %7 = arith.truncf %6 : vector<32x20xf32> to vector<32x20xbf16>
    %c0_5 = arith.constant 0 : index
    %c0_6 = arith.constant 0 : index
    %c0_7 = arith.constant 0 : index
    %8 = vector.load %arg3[%c0_5, %c0_6, %c0_7] : memref<3x32x32xbf16, #tpu.memory_space<vmem>>, vector<1x32x32xbf16>
    %9 = vector.shape_cast %8 : vector<1x32x32xbf16> to vector<32x32xbf16>
    %10 = vector.extract_strided_slice %7 {offsets = [0, 0], sizes = [32, 18], strides = [1, 1]} : vector<32x20xbf16> to vector<32x18xbf16>
    %cst = arith.constant dense<0.000000e+00> : vector<32x18xf32>
    %11 = tpu.matmul %9, %10, %cst {dimension_numbers = #tpu.dot_dimension_numbers<[1], [0], [0], [1], [0, 0, 1, 1], [], []>} : vector<32x32xbf16>, vector<32x18xbf16>, vector<32x18xf32> -> vector<32x18xf32>
    %c1 = arith.constant 1 : index
    %c0_8 = arith.constant 0 : index
    %c0_9 = arith.constant 0 : index
    %12 = vector.load %arg3[%c1, %c0_8, %c0_9] : memref<3x32x32xbf16, #tpu.memory_space<vmem>>, vector<1x32x32xbf16>
    %13 = vector.shape_cast %12 : vector<1x32x32xbf16> to vector<32x32xbf16>
    %14 = vector.extract_strided_slice %7 {offsets = [0, 1], sizes = [32, 18], strides = [1, 1]} : vector<32x20xbf16> to vector<32x18xbf16>
    %cst_10 = arith.constant dense<0.000000e+00> : vector<32x18xf32>
    %15 = tpu.matmul %13, %14, %cst_10 {dimension_numbers = #tpu.dot_dimension_numbers<[1], [0], [0], [1], [0, 0, 1, 1], [], []>} : vector<32x32xbf16>, vector<32x18xbf16>, vector<32x18xf32> -> vector<32x18xf32>
    %16 = arith.addf %11, %15 : vector<32x18xf32>
    %c2 = arith.constant 2 : index
    %c0_11 = arith.constant 0 : index
    %c0_12 = arith.constant 0 : index
    %17 = vector.load %arg3[%c2, %c0_11, %c0_12] : memref<3x32x32xbf16, #tpu.memory_space<vmem>>, vector<1x32x32xbf16>
    %18 = vector.shape_cast %17 : vector<1x32x32xbf16> to vector<32x32xbf16>
    %19 = vector.extract_strided_slice %7 {offsets = [0, 2], sizes = [32, 18], strides = [1, 1]} : vector<32x20xbf16> to vector<32x18xbf16>
    %cst_13 = arith.constant dense<0.000000e+00> : vector<32x18xf32>
    %20 = tpu.matmul %18, %19, %cst_13 {dimension_numbers = #tpu.dot_dimension_numbers<[1], [0], [0], [1], [0, 0, 1, 1], [], []>} : vector<32x32xbf16>, vector<32x18xbf16>, vector<32x18xf32> -> vector<32x18xf32>
    %21 = arith.addf %16, %20 : vector<32x18xf32>
    %c0_14 = arith.constant 0 : index
    %c0_15 = arith.constant 0 : index
    %22 = vector.load %arg4[%c0_14, %c0_15] : memref<32x1xf32, #tpu.memory_space<vmem>>, vector<32x1xf32>
    %23 = vector.broadcast %22 : vector<32x1xf32> to vector<32x18xf32>
    %24 = arith.addf %21, %23 : vector<32x18xf32>
    %cst_16 = arith.constant 0.000000e+00 : f32
    %25 = vector.broadcast %cst_16 : f32 to vector<32x18xf32>
    %26 = arith.maximumf %24, %25 : vector<32x18xf32>
    %cst_17 = arith.constant dense<0.000000e+00> : vector<18xf32>
    %27 = vector.multi_reduction <add>, %26, %cst_17 [0] : vector<32x18xf32> to vector<18xf32>
    %28 = vector.shape_cast %27 : vector<18xf32> to vector<1x18xf32>
    %29 = arith.mulf %26, %26 : vector<32x18xf32>
    %cst_18 = arith.constant dense<0.000000e+00> : vector<18xf32>
    %30 = vector.multi_reduction <add>, %29, %cst_18 [0] : vector<32x18xf32> to vector<18xf32>
    %31 = vector.shape_cast %30 : vector<18xf32> to vector<1x18xf32>
    %cst_19 = arith.constant 3.125000e-02 : f32
    %32 = vector.broadcast %cst_19 : f32 to vector<1x18xf32>
    %33 = arith.mulf %28, %32 : vector<1x18xf32>
    %cst_20 = arith.constant 3.125000e-02 : f32
    %34 = vector.broadcast %cst_20 : f32 to vector<1x18xf32>
    %35 = arith.mulf %31, %34 : vector<1x18xf32>
    %36 = arith.mulf %33, %33 : vector<1x18xf32>
    %37 = arith.subf %35, %36 : vector<1x18xf32>
    %cst_21 = arith.constant 0.000000e+00 : f32
    %38 = vector.broadcast %cst_21 : f32 to vector<1x18xf32>
    %39 = arith.maximumf %37, %38 : vector<1x18xf32>
    %40 = vector.broadcast %33 : vector<1x18xf32> to vector<32x18xf32>
    %41 = arith.subf %26, %40 : vector<32x18xf32>
    %cst_22 = arith.constant 9.99999974E-6 : f32
    %42 = vector.broadcast %cst_22 : f32 to vector<1x18xf32>
    %43 = arith.addf %39, %42 : vector<1x18xf32>
    %44 = math.rsqrt %43 : vector<1x18xf32>
    %45 = vector.broadcast %44 : vector<1x18xf32> to vector<32x18xf32>
    %46 = arith.mulf %41, %45 : vector<32x18xf32>
    %c0_23 = arith.constant 0 : index
    %c0_24 = arith.constant 0 : index
    %47 = vector.load %arg5[%c0_23, %c0_24] : memref<32x1xf32, #tpu.memory_space<vmem>>, vector<32x1xf32>
    %48 = vector.broadcast %47 : vector<32x1xf32> to vector<32x18xf32>
    %49 = arith.mulf %46, %48 : vector<32x18xf32>
    %c0_25 = arith.constant 0 : index
    %c0_26 = arith.constant 0 : index
    %50 = vector.load %arg6[%c0_25, %c0_26] : memref<32x1xf32, #tpu.memory_space<vmem>>, vector<32x1xf32>
    %51 = vector.broadcast %50 : vector<32x1xf32> to vector<32x18xf32>
    %52 = arith.addf %49, %51 : vector<32x18xf32>
    %53 = vector.extract_strided_slice %3 {offsets = [0, 1], sizes = [1, 18], strides = [1, 1]} : vector<1x20xf32> to vector<1x18xf32>
    %54 = vector.broadcast %53 : vector<1x18xf32> to vector<32x18xf32>
    %55 = arith.mulf %52, %54 : vector<32x18xf32>
    %56 = arith.truncf %55 : vector<32x18xf32> to vector<32x18xbf16>
    %c0_27 = arith.constant 0 : index
    %c0_28 = arith.constant 0 : index
    %c0_29 = arith.constant 0 : index
    %57 = vector.load %arg7[%c0_27, %c0_28, %c0_29] : memref<3x32x32xbf16, #tpu.memory_space<vmem>>, vector<1x32x32xbf16>
    %58 = vector.shape_cast %57 : vector<1x32x32xbf16> to vector<32x32xbf16>
    %59 = vector.extract_strided_slice %56 {offsets = [0, 0], sizes = [32, 16], strides = [1, 1]} : vector<32x18xbf16> to vector<32x16xbf16>
    %cst_30 = arith.constant dense<0.000000e+00> : vector<32x16xf32>
    %60 = tpu.matmul %58, %59, %cst_30 {dimension_numbers = #tpu.dot_dimension_numbers<[1], [0], [0], [1], [0, 0, 1, 1], [], []>} : vector<32x32xbf16>, vector<32x16xbf16>, vector<32x16xf32> -> vector<32x16xf32>
    %c1_31 = arith.constant 1 : index
    %c0_32 = arith.constant 0 : index
    %c0_33 = arith.constant 0 : index
    %61 = vector.load %arg7[%c1_31, %c0_32, %c0_33] : memref<3x32x32xbf16, #tpu.memory_space<vmem>>, vector<1x32x32xbf16>
    %62 = vector.shape_cast %61 : vector<1x32x32xbf16> to vector<32x32xbf16>
    %63 = vector.extract_strided_slice %56 {offsets = [0, 1], sizes = [32, 16], strides = [1, 1]} : vector<32x18xbf16> to vector<32x16xbf16>
    %cst_34 = arith.constant dense<0.000000e+00> : vector<32x16xf32>
    %64 = tpu.matmul %62, %63, %cst_34 {dimension_numbers = #tpu.dot_dimension_numbers<[1], [0], [0], [1], [0, 0, 1, 1], [], []>} : vector<32x32xbf16>, vector<32x16xbf16>, vector<32x16xf32> -> vector<32x16xf32>
    %65 = arith.addf %60, %64 : vector<32x16xf32>
    %c2_35 = arith.constant 2 : index
    %c0_36 = arith.constant 0 : index
    %c0_37 = arith.constant 0 : index
    %66 = vector.load %arg7[%c2_35, %c0_36, %c0_37] : memref<3x32x32xbf16, #tpu.memory_space<vmem>>, vector<1x32x32xbf16>
    %67 = vector.shape_cast %66 : vector<1x32x32xbf16> to vector<32x32xbf16>
    %68 = vector.extract_strided_slice %56 {offsets = [0, 2], sizes = [32, 16], strides = [1, 1]} : vector<32x18xbf16> to vector<32x16xbf16>
    %cst_38 = arith.constant dense<0.000000e+00> : vector<32x16xf32>
    %69 = tpu.matmul %67, %68, %cst_38 {dimension_numbers = #tpu.dot_dimension_numbers<[1], [0], [0], [1], [0, 0, 1, 1], [], []>} : vector<32x32xbf16>, vector<32x16xbf16>, vector<32x16xf32> -> vector<32x16xf32>
    %70 = arith.addf %65, %69 : vector<32x16xf32>
    %c0_39 = arith.constant 0 : index
    %c0_40 = arith.constant 0 : index
    %71 = vector.load %arg8[%c0_39, %c0_40] : memref<32x1xf32, #tpu.memory_space<vmem>>, vector<32x1xf32>
    %72 = vector.broadcast %71 : vector<32x1xf32> to vector<32x16xf32>
    %73 = arith.addf %70, %72 : vector<32x16xf32>
    %cst_41 = arith.constant 0.000000e+00 : f32
    %74 = vector.broadcast %cst_41 : f32 to vector<32x16xf32>
    %75 = arith.maximumf %73, %74 : vector<32x16xf32>
    %cst_42 = arith.constant dense<0.000000e+00> : vector<16xf32>
    %76 = vector.multi_reduction <add>, %75, %cst_42 [0] : vector<32x16xf32> to vector<16xf32>
    %77 = vector.shape_cast %76 : vector<16xf32> to vector<1x16xf32>
    %78 = arith.mulf %75, %75 : vector<32x16xf32>
    %cst_43 = arith.constant dense<0.000000e+00> : vector<16xf32>
    %79 = vector.multi_reduction <add>, %78, %cst_43 [0] : vector<32x16xf32> to vector<16xf32>
    %80 = vector.shape_cast %79 : vector<16xf32> to vector<1x16xf32>
    %cst_44 = arith.constant 3.125000e-02 : f32
    %81 = vector.broadcast %cst_44 : f32 to vector<1x16xf32>
    %82 = arith.mulf %77, %81 : vector<1x16xf32>
    %cst_45 = arith.constant 3.125000e-02 : f32
    %83 = vector.broadcast %cst_45 : f32 to vector<1x16xf32>
    %84 = arith.mulf %80, %83 : vector<1x16xf32>
    %85 = arith.mulf %82, %82 : vector<1x16xf32>
    %86 = arith.subf %84, %85 : vector<1x16xf32>
    %cst_46 = arith.constant 0.000000e+00 : f32
    %87 = vector.broadcast %cst_46 : f32 to vector<1x16xf32>
    %88 = arith.maximumf %86, %87 : vector<1x16xf32>
    %89 = vector.broadcast %82 : vector<1x16xf32> to vector<32x16xf32>
    %90 = arith.subf %75, %89 : vector<32x16xf32>
    %cst_47 = arith.constant 9.99999974E-6 : f32
    %91 = vector.broadcast %cst_47 : f32 to vector<1x16xf32>
    %92 = arith.addf %88, %91 : vector<1x16xf32>
    %93 = math.rsqrt %92 : vector<1x16xf32>
    %94 = vector.broadcast %93 : vector<1x16xf32> to vector<32x16xf32>
    %95 = arith.mulf %90, %94 : vector<32x16xf32>
    %c0_48 = arith.constant 0 : index
    %c0_49 = arith.constant 0 : index
    %96 = vector.load %arg9[%c0_48, %c0_49] : memref<32x1xf32, #tpu.memory_space<vmem>>, vector<32x1xf32>
    %97 = vector.broadcast %96 : vector<32x1xf32> to vector<32x16xf32>
    %98 = arith.mulf %95, %97 : vector<32x16xf32>
    %c0_50 = arith.constant 0 : index
    %c0_51 = arith.constant 0 : index
    %99 = vector.load %arg10[%c0_50, %c0_51] : memref<32x1xf32, #tpu.memory_space<vmem>>, vector<32x1xf32>
    %100 = vector.broadcast %99 : vector<32x1xf32> to vector<32x16xf32>
    %101 = arith.addf %98, %100 : vector<32x16xf32>
    %102 = vector.extract_strided_slice %3 {offsets = [0, 2], sizes = [1, 16], strides = [1, 1]} : vector<1x20xf32> to vector<1x16xf32>
    %c0_52 = arith.constant 0 : index
    %c0_53 = arith.constant 0 : index
    %103 = vector.load %arg11[%c0_52, %c0_53] : memref<32x1xf32, #tpu.memory_space<vmem>>, vector<32x1xf32>
    %104 = vector.broadcast %103 : vector<32x1xf32> to vector<32x16xf32>
    %105 = arith.mulf %101, %104 : vector<32x16xf32>
    %cst_54 = arith.constant dense<0.000000e+00> : vector<16xf32>
    %106 = vector.multi_reduction <add>, %105, %cst_54 [0] : vector<32x16xf32> to vector<16xf32>
    %107 = vector.shape_cast %106 : vector<16xf32> to vector<1x16xf32>
    %c0_55 = arith.constant 0 : index
    %c0_56 = arith.constant 0 : index
    %108 = vector.load %arg12[%c0_55, %c0_56] : memref<1x1xf32, #tpu.memory_space<vmem>>, vector<1x1xf32>
    %109 = vector.broadcast %108 : vector<1x1xf32> to vector<1x16xf32>
    %110 = arith.addf %107, %109 : vector<1x16xf32>
    %111 = arith.mulf %110, %102 : vector<1x16xf32>
    %c0_57 = arith.constant 0 : index
    %c0_58 = arith.constant 0 : index
    %c0_59 = arith.constant 0 : index
    %112 = vector.load %arg13[%c0_57, %c0_58, %c0_59] : memref<1x1x16xf32, #tpu.memory_space<vmem>>, vector<1x1x16xf32>
    %113 = vector.shape_cast %112 : vector<1x1x16xf32> to vector<1x16xf32>
    %114 = vector.shape_cast %111 : vector<1x16xf32> to vector<1x1x16xf32>
    tpu.vector_store %arg13[%c0_57, %c0_58, %c0_59], %114 {strides = array<i32>} : memref<1x1x16xf32, #tpu.memory_space<vmem>>, vector<1x1x16xf32>,
    return
  }
  func.func @transform_0(%arg0: i32) -> (i32, i32, i32) {
    %c0_i32 = arith.constant 0 : i32
    %c0_i32_0 = arith.constant 0 : i32
    %c0_i32_1 = arith.constant 0 : i32
    return %arg0, %c0_i32, %c0_i32_0 : i32, i32, i32
  }
  func.func @transform_1(%arg0: i32) -> (i32, i32, i32) {
    %c0_i32 = arith.constant 0 : i32
    %c0_i32_0 = arith.constant 0 : i32
    %c0_i32_1 = arith.constant 0 : i32
    return %arg0, %c0_i32, %c0_i32_0 : i32, i32, i32
  }
  func.func @transform_2(%arg0: i32) -> (i32, i32, i32) {
    %c0_i32 = arith.constant 0 : i32
    %c0_i32_0 = arith.constant 0 : i32
    %c0_i32_1 = arith.constant 0 : i32
    %c0_i32_2 = arith.constant 0 : i32
    return %c0_i32, %c0_i32_0, %c0_i32_1 : i32, i32, i32
  }
  func.func @transform_3(%arg0: i32) -> (i32, i32) {
    %c0_i32 = arith.constant 0 : i32
    %c0_i32_0 = arith.constant 0 : i32
    %c0_i32_1 = arith.constant 0 : i32
    return %c0_i32, %c0_i32_0 : i32, i32
  }
  func.func @transform_4(%arg0: i32) -> (i32, i32) {
    %c0_i32 = arith.constant 0 : i32
    %c0_i32_0 = arith.constant 0 : i32
    %c0_i32_1 = arith.constant 0 : i32
    return %c0_i32, %c0_i32_0 : i32, i32
  }
  func.func @transform_5(%arg0: i32) -> (i32, i32) {
    %c0_i32 = arith.constant 0 : i32
    %c0_i32_0 = arith.constant 0 : i32
    %c0_i32_1 = arith.constant 0 : i32
    return %c0_i32, %c0_i32_0 : i32, i32
  }
  func.func @transform_6(%arg0: i32) -> (i32, i32, i32) {
    %c0_i32 = arith.constant 0 : i32
    %c0_i32_0 = arith.constant 0 : i32
    %c0_i32_1 = arith.constant 0 : i32
    %c0_i32_2 = arith.constant 0 : i32
    return %c0_i32, %c0_i32_0, %c0_i32_1 : i32, i32, i32
  }
  func.func @transform_7(%arg0: i32) -> (i32, i32) {
    %c0_i32 = arith.constant 0 : i32
    %c0_i32_0 = arith.constant 0 : i32
    %c0_i32_1 = arith.constant 0 : i32
    return %c0_i32, %c0_i32_0 : i32, i32
  }
  func.func @transform_8(%arg0: i32) -> (i32, i32) {
    %c0_i32 = arith.constant 0 : i32
    %c0_i32_0 = arith.constant 0 : i32
    %c0_i32_1 = arith.constant 0 : i32
    return %c0_i32, %c0_i32_0 : i32, i32
  }
  func.func @transform_9(%arg0: i32) -> (i32, i32) {
    %c0_i32 = arith.constant 0 : i32
    %c0_i32_0 = arith.constant 0 : i32
    %c0_i32_1 = arith.constant 0 : i32
    return %c0_i32, %c0_i32_0 : i32, i32
  }
  func.func @transform_10(%arg0: i32) -> (i32, i32) {
    %c0_i32 = arith.constant 0 : i32
    %c0_i32_0 = arith.constant 0 : i32
    %c0_i32_1 = arith.constant 0 : i32
    return %c0_i32, %c0_i32_0 : i32, i32
  }
  func.func @transform_11(%arg0: i32) -> (i32, i32) {
    %c0_i32 = arith.constant 0 : i32
    %c0_i32_0 = arith.constant 0 : i32
    %c0_i32_1 = arith.constant 0 : i32
    return %c0_i32, %c0_i32_0 : i32, i32
  }
  func.func @transform_12(%arg0: i32) -> (i32, i32, i32) {
    %c0_i32 = arith.constant 0 : i32
    %c0_i32_0 = arith.constant 0 : i32
    %c0_i32_1 = arith.constant 0 : i32
    return %arg0, %c0_i32, %c0_i32_0 : i32, i32, i32
  }
}

</mosaic_0001>

<bundles_post_ra>
// kernel: tpu_custom_call.1
= control target key start
LH: loop header
LB: loop body
LE: loop exit
PB: predicated region body
PF: predicated region fallthrough
CT: control target
= control target key end

     0   :  { %s1933_s0 = inlined_call_operand.vmem [shape: bf16[2,32,20], index: 0, kind: input, shape index: {}]   ;;  %s1934_s1 = inlined_call_operand.vmem [shape: f32[2,1,20], index: 1, kind: input, shape index: {}]   ;;  %s1935_s2 = inlined_call_operand.vmem [shape: bf16[3,32,32], index: 2, kind: input, shape index: {}]   ;;  %s1936_s3 = inlined_call_operand.vmem [shape: f32[32,1], index: 3, kind: input, shape index: {}]   ;;  %s1937_s4 = inlined_call_operand.vmem [shape: f32[32,1], index: 4, kind: input, shape index: {}]   ;;  %s1938_s5 = inlined_call_operand.vmem [shape: f32[32,1], index: 5, kind: input, shape index: {}]   ;;  %s1939_s6 = inlined_call_operand.vmem [shape: bf16[3,32,32], index: 6, kind: input, shape index: {}]   ;;  %s1940_s7 = inlined_call_operand.vmem [shape: f32[32,1], index: 7, kind: input, shape index: {}]   ;;  %s1941_s8 = inlined_call_operand.vmem [shape: f32[32,1], index: 8, kind: input, shape index: {}]   ;;  %s1942_s9 = inlined_call_operand.vmem [shape: f32[32,1], index: 9, kind: input, shape index: {}]   ;;  %s1943_s10 = inlined_call_operand.vmem [shape: f32[32,1], index: 10, kind: input, shape index: {}]   ;;  %s1944_s11 = inlined_call_operand.<no memory space> [shape: f32[1,1], index: 11, kind: input, shape index: {}]   ;;  %s1945_s12 = inlined_call_operand.hbm [shape: f32[2,1,16], index: 12, kind: output, shape index: {}]  }
   0x1   :  { %1950 = sst [smem:[#allocation6_spill]] %s1933_s0  ;;  %v17_v0 = vstv %s1944_s11 }
   0x2   :  { %18 = vst [vmem:[#allocation2] sm:$0x1] %v17_v0 }
   0x3   :  { %19 = vsyncpa [#allocation4], 0 }
   0x4   :  { %21 = vsyncpa [#allocation4 + $0x1], 0  ;;  %s1660_s23 = smov 0   ;;  %s1662_s24 = smov 0  }
   0x5   :  { %s1664_s25 = smov 0   ;;  %s1666_s26 = smov 0  }
   0x6 LB: > { %s1681_s11 = sadd.s32 4294967295, %s1586_s26   ;;  %s1316_s27 = sadd.s32 4294967294, %s1586_s26   ;;  %s1586_s26 = sphi %s1666_s26, %s1959_s26   ;;  %s1582_s25 = sphi %s1664_s25, %s1958_s25   ;;  %s1578_s24 = sphi %s1662_s24, %s1957_s24   ;;  %s1574_s23 = sphi %s1660_s23, %s1956_s23  }
   0x7   : > { %s1685_s28 = sadd.s32 1, %s1586_s26   ;;  %s296_s29 = sadd.s32 1, %s1582_s25 }
   0x8   : > { %s293_s30 = ssub.s32 %s1586_s26, %s1685_s28  ;;  %p306_p0 = scmp.ne.s32.totalorder %s1582_s25, %s1578_s24 }
   0x9   : > { %p294_p1 = scmp.eq.s32.totalorder %s293_s30, 0  ;;  %p307_p2 = scmp.eq.s32.totalorder %s1681_s11, 1 }
   0xa   : > { %p312_p3 = scmp.ne.s32.totalorder %s1578_s24, %s1574_s23  ;;  %p313_p4 = scmp.eq.s32.totalorder %s1316_s27, 1 }
   0xb   : > { %s1696_s13 = scalar_select %p294_p1, %s1582_s25, %s296_s29  }
   0xc   : > { %p1698_p5 = por %p307_p2, %p306_p0  ;;  %p1702_p6 = por %p313_p4, %p312_p3 }
   0xd   : > { %p1319_p7 = scmp.ge.s32.totalorder %s1586_s26, 1  ;;  %p375_p8 = scmp.lt.s32.totalorder %s1586_s26, 3 }
   0xf   : > { %p376_p9 = pnand %p1319_p7, %p375_p8 }
  0x10   : > { %p419_p10 = scmp.lt.s32.totalorder (!%p376_p9), %s1681_s11, 1  ;;  %s1953_s0 = sld [smem:[#allocation6_spill]] (!%p376_p9)  ;;  %v1508_v2 = vld [vmem:[%s1935_s2 + $0x10] sm:$0xff] (!%p376_p9)   ;;  %vm476_vm0 = vcmask (!%p376_p9), 261120   ;;  %v678_v15 = vld [vmem:[%s1936_s3 + $0x8] sm:$0xff] (!%p376_p9)  ;;  %v677_v16 = vld [vmem:[%s1936_s3] sm:$0xff] (!%p376_p9) }
  0x11   : > { %379 = sbr.rel (%p376_p9) target bundleno = 902 (0x386), region = 68  ;;  %1404 = vmatprep.mubr.msk.bf16.mxu0 (!%p376_p9), %vm476_vm0, %v1508_v2  ;;  %v1590_v17 = vmov (!%p376_p9), 0   ;;  %v679_v18 = vld [vmem:[%s1936_s3 + $0x10] sm:$0xff] (!%p376_p9)  ;;  %v680_v19 = vld [vmem:[%s1936_s3 + $0x18] sm:$0xff] (!%p376_p9)  ;;  %v755_v20 = vld [vmem:[%s1937_s4] sm:$0xff] (!%p376_p9)  ;;  %s1954_s22 = smov (!%p376_p9), 127  }
  0x12   : > { %1507 = vset.pattern.permute.xlu1 (!%p376_p9), %v1590_v17  ;;  %1506 = vset.pattern.permute.xlu0 (!%p376_p9), %v1590_v17  ;;  %v756_v21 = vld [vmem:[%s1937_s4 + $0x8] sm:$0xff] (!%p376_p9)  ;;  %v783_v22 = vld [vmem:[%s1938_s5] sm:$0xff] (!%p376_p9)  ;;  %v757_v24 = vld [vmem:[%s1937_s4 + $0x10] sm:$0xff] (!%p376_p9)  ;;  %vm709_vm1 = vcmask (!%p376_p9), 146432   ;;  %s1955_s18 = smov (!%p376_p9), 126   ;;  %vm1079_vm2 = vcmask (!%p376_p9), 130048  }
  0x13   : > { %v784_v23 = vld [vmem:[%s1938_s5 + $0x8] sm:$0xff] (!%p376_p9)  ;;  %v758_v25 = vld [vmem:[%s1937_s4 + $0x18] sm:$0xff] (!%p376_p9)  ;;  %v785_v26 = vld [vmem:[%s1938_s5 + $0x10] sm:$0xff] (!%p376_p9)  ;;  %s1363_s21 = sshll.u32 (!%p376_p9), %s1681_s11, 4  ;;  %vm1237_vm3 = vcmask (!%p376_p9), 122880  }
  0x14   : > { %v786_v27 = vld [vmem:[%s1938_s5 + $0x18] sm:$0xff] (!%p376_p9)  ;;  %v1510_v31 = vld [vmem:[%s1935_s2] sm:$0xff] (!%p376_p9)   ;;  %v1511_v33 = vld [vmem:[%s1935_s2 + $0x8] sm:$0xff] (!%p376_p9)   ;;  %s1891_s29 = scalar_lea.hbm (!%p376_p9), %s1945_s12, %s1363_s21 }
  0x15   : > { %v1509_v30 = vld [vmem:[%s1935_s2 + $0x18] sm:$0xff] (!%p376_p9)   ;;  %v1512_v34 = vld [vmem:[%s1935_s2 + $0x20] sm:$0xff] (!%p376_p9)   ;;  %v1513_v36 = vld [vmem:[%s1935_s2 + $0x28] sm:$0xff] (!%p376_p9)  }
  0x18   : > { %s420_s16 = scalar_select %p419_p10, %s1681_s11, 1 }
  0x19   : > { %s1591_s11 = smov [#allocation3]  }
  0x1a   : > { %s1366_s17 = sshll.u32 %s420_s16, 4  ;;  %s426_s20 = scalar_lea.vmem %s1934_s1, %s420_s16 }
  0x1b   : > { %s423_s27 = scalar_lea.vmem %s1953_s0, %s1366_s17  ;;  %v1716_v1 = vld [vmem:[%s426_s20] ss:$0 sm:$0xff]  ;;  %s1948_s16 = smov 127  }
  0x1c   : > { %v1368_v3 = vld [vmem:[%s423_s27] sm:$0xff]   ;;  %v1375_v4 = vld [vmem:[%s423_s27 + $0x8] sm:$0xff]   ;;  %s1946_s17 = smov 126   ;;  %s417_s20 = sand.u32 1, %s1578_s24  }
  0x1d   : > { %v1369_v5 = vunpack.c.l.bf16 %v1368_v3  ;;  %v1370_v6 = vunpack.c.h.bf16 %v1368_v3  ;;  %v1373_v7 = vunpack.c.l.bf16 %v1375_v4  ;;  %v1374_v8 = vunpack.c.h.bf16 %v1375_v4  ;;  %s1528_s30 = sshll.u32 %s1591_s11, 4  ;;  %s1529_s30 = int_to_ptr.vmem [resolvable:$false] %s1528_s30 }
  0x1e   : > { %s1530_s19 = scalar_lea.vmem %s1529_s30, 32 }
  0x1f   : > { %v443_v9 = vmul.f32 %v1369_v5, %v1716_v1  ;;  %v444_v10 = vmul.f32 %v1370_v6, %v1716_v1  ;;  %v445_v11 = vmul.f32 %v1373_v7, %v1716_v1  ;;  %v446_v12 = vmul.f32 %v1374_v8, %v1716_v1 }
  0x21   : > { %v447_v13 = vpack.c.bf16 %v444_v10, %v443_v9  ;;  %v448_v14 = vpack.c.bf16 %v446_v12, %v445_v11 }
  0x23   : > { %470 = vrot.lane.b32.xlu0 %v447_v13, %s1948_s16  ;;  %612 = vrot.lane.b32.xlu1 %v447_v13, %s1946_s17 }
  0x27   : > { %472 = vrot.lane.b32.xlu0 %v448_v14, %s1948_s16  ;;  %614 = vrot.lane.b32.xlu1 %v448_v14, %s1946_s17  ;;  %s418_s16 = scalar_lea.vmem [#allocation3], %s417_s20 }
  0x28   : > { %s1252_s17 = sshll.u32 %s418_s16, 4  ;;  %s1893_s17 = int_to_ptr.vmem [resolvable:$true] %s1252_s17 }
  0x29   : > { %s1524_s0 = scalar_lea.vmem %s1893_s17, 16  ;;  %p1531_p0 = scmp.lt.s32.totalorder %s1893_s17, %s1529_s30 }
  0x2a   : > { %p1525_p11 = scmp.ne.s32.totalorder %s1893_s17, %s1524_s0  ;;  %p1532_p1 = scmp.lt.s32.totalorder %s1530_s19, %s1524_s0 }
  0x2b   : > { %688 = vperm.xlu1 %1507, %v678_v15   ;;  %683 = vperm.xlu0 %1506, %v677_v16  }
  0x2c   : > { %p1526_p12 = pnand %p1525_p11, %p1698_p5  ;;  %p1533_p2 = por %p1532_p1, %p1531_p0 }
  0x2e   : > { %p1527_p13 = pneg %p1526_p12 }
  0x2f   : > { %693 = vperm.xlu1 %1507, %v679_v18   ;;  %698 = vperm.xlu0 %1506, %v680_v19  }
  0x30   : > { %p1534_p3 = pnand %p1533_p2, %p1527_p13 }
  0x33   : > { %761 = vperm.xlu1 %1507, %v755_v20   ;;  %766 = vperm.xlu0 %1506, %v756_v21  }
  0x37   : > { %789 = vperm.xlu1 %1507, %v783_v22   ;;  %794 = vperm.xlu0 %1506, %v784_v23  }
  0x3b   : > { %771 = vperm.xlu1 %1507, %v757_v24   ;;  %776 = vperm.xlu0 %1506, %v758_v25  }
  0x3f   : > { %799 = vperm.xlu1 %1507, %v785_v26   ;;  %804 = vperm.xlu0 %1506, %v786_v27  }
  0x43   : > { %811 = vrot.lane.b32.xlu1 %v1716_v1, %s1954_s22 }
  0x95   : > { %v471_v28 = vpop.permute.xlu0 %470  ;;  %v613_v32 = vpop.permute.xlu1 %612 }
  0x96   : > { %1400 = vmatprep.subr.bf16.mxu0 %v471_v28 }
  0x97   : > { %1401 = vmatpush3.bf16.msra.mxu0 %v471_v28 }
  0x99   : > { %v473_v29 = vpop.permute.xlu0 %472  ;;  %v615_v35 = vpop.permute.xlu1 %614 }
  0x9a   : > { %1402 = vmatprep.subr.bf16.mxu0 %v473_v29 }
  0x9b   : > { %1403 = vmatpush3.bf16.msra.mxu0 %v473_v29 }
  0x9c   : > { %1408 = vmatprep.subr.bf16.mxu0 %v447_v13 }
  0x9e   : > { %1405 = vmatmul.mubr.msk.bf16.vlgmr.msra.gmra.mrb[0].mxu0 %vm476_vm0, %v1509_v30 }
  0x9f   : > { %1409 = vmatpush3.bf16.msra.mxu0 %v447_v13  ;;  %1412 = vmatprep.mubr.msk.bf16.mxu0 %vm476_vm0, %v1510_v31 }
  0xa0   : > { %1410 = vmatprep.subr.bf16.mxu0 %v448_v14 }
  0xa3   : > { %1411 = vmatpush3.bf16.msra.mxu0 %v448_v14 }
  0xa4   : > { %1416 = vmatprep.subr.bf16.mxu0 %v613_v32 }
  0xaa   : > { %1413 = vmatmul.mubr.msk.bf16.vlgmr.msra.gmra.mrb[0].mxu0 %vm476_vm0, %v1511_v33  ;;  %v689_v37 = vpop.permute.xlu1 %688  ;;  %v684_v38 = vpop.permute.xlu0 %683 }
  0xab   : > { %1417 = vmatpush3.bf16.msra.mxu0 %v613_v32  ;;  %1420 = vmatprep.mubr.msk.bf16.mxu0 %vm476_vm0, %v1512_v34 }
  0xac   : > { %1418 = vmatprep.subr.bf16.mxu0 %v615_v35 }
  0xae   : > { %v694_v39 = vpop.permute.xlu1 %693  ;;  %v699_v43 = vpop.permute.xlu0 %698 }
  0xaf   : > { %1419 = vmatpush3.bf16.msra.mxu0 %v615_v35 }
  0xb2   : > { %v762_v21 = vpop.permute.xlu1 %761  ;;  %v767_v29 = vpop.permute.xlu0 %766 }
  0xb6   : > { %1421 = vmatmul.mubr.msk.bf16.vlgmr.msra.gmra.mrb[0].mxu0 %vm476_vm0, %v1513_v36  ;;  %v790_v31 = vpop.permute.xlu1 %789  ;;  %v795_v33 = vpop.permute.xlu0 %794 }
  0xba   : > { %v772_v34 = vpop.permute.xlu1 %771  ;;  %v777_v35 = vpop.permute.xlu0 %776 }
 0x189   : > { %v1422_v40 = vpop.f32.mrb[0].mxu0 }
 0x18a   : > { %v703_v41 = vadd.f32 %v1422_v40, %v694_v39  ;;  %v658_v42 = vpop.f32.mrb[1].mxu0 }
 0x18b   : > { %v701_v44 = vadd.f32 %v684_v38, %v658_v42  ;;  %v1423_v45 = vpop.f32.mrb[2].mxu0 }
 0x18c   : > { %v704_v46 = vadd.f32 %v1423_v45, %v699_v43  ;;  %v661_v47 = vpop.f32.mrb[3].mxu0  ;;  %v707_v48 = vmax.f32 %v703_v41, 0.0 }
 0x18d   : > { %v705_v49 = vmax.f32 %v701_v44, 0.0  ;;  %v702_v50 = vadd.f32 %v689_v37, %v661_v47  ;;  %v800_v37 = vpop.permute.xlu1 %799 }
 0x18e   : > { %v708_v52 = vmax.f32 %v704_v46, 0.0  ;;  %v725_v54 = vmul.f32 %v707_v48, %v707_v48  ;;  %v713_v59 = vsel %vm709_vm1, %v707_v48, 0.0  ;;  %v805_v46 = vpop.permute.xlu0 %804 }
 0x18f   : > { %v723_v51 = vmul.f32 %v705_v49, %v705_v49  ;;  %v706_v53 = vmax.f32 %v702_v50, 0.0  ;;  %v710_v55 = vsel %vm709_vm1, %v705_v49, 0.0 }
 0x190   : > { %v726_v61 = vmul.f32 %v708_v52, %v708_v52  ;;  %v730_v2 = vsel %vm709_vm1, %v725_v54, 0.0  ;;  %v715_v3 = vsel %vm709_vm1, %v708_v52, 0.0 }
 0x191   : > { %v711_v56 = vsel %vm709_vm1, %v706_v53, 0.0  ;;  %v724_v57 = vmul.f32 %v706_v53, %v706_v53  ;;  %v727_v60 = vsel %vm709_vm1, %v723_v51, 0.0  ;;  %v812_v47 = vpop.permute.xlu1 %811 }
 0x192   : > { %v712_v58 = vadd.f32 %v711_v56, %v710_v55  ;;  %v732_v6 = vsel %vm709_vm1, %v726_v61, 0.0  ;;  %v1049_v61 = vld [vmem:[%s1940_s7 + $0x10] sm:$0xff] }
 0x193   : > { %v728_v62 = vsel %vm709_vm1, %v724_v57, 0.0 }
 0x194   : > { %v714_v63 = vadd.f32 %v713_v59, %v712_v58  ;;  %v729_v0 = vadd.f32 %v728_v62, %v727_v60  ;;  %v1047_v59 = vld [vmem:[%s1940_s7] sm:$0xff]  ;;  %v1048_v60 = vld [vmem:[%s1940_s7 + $0x8] sm:$0xff]  ;;  %v1050_v62 = vld [vmem:[%s1940_s7 + $0x18] sm:$0xff] }
 0x196   : > { %v716_v4 = vadd.f32 %v715_v3, %v714_v63  ;;  %v731_v5 = vadd.f32 %v730_v2, %v729_v0  ;;  %v1125_v63 = vld [vmem:[%s1941_s8] sm:$0xff]  ;;  %v1126_v0 = vld [vmem:[%s1941_s8 + $0x8] sm:$0xff]  ;;  %v1127_v2 = vld [vmem:[%s1941_s8 + $0x10] sm:$0xff] }
 0x197   : > { %v1153_v3 = vld [vmem:[%s1942_s9] sm:$0xff] }
 0x198   : > { %v717_v7 = vrot.slane %v716_v4, 4  ;;  %v733_v8 = vadd.f32 %v732_v6, %v731_v5  ;;  %v1128_v5 = vld [vmem:[%s1941_s8 + $0x18] sm:$0xff]  ;;  %v1155_v6 = vld [vmem:[%s1942_s9 + $0x10] sm:$0xff] }
 0x19a   : > { %v718_v9 = vadd.f32 %v717_v7, %v716_v4  ;;  %v734_v10 = vrot.slane %v733_v8, 4  ;;  %v1154_v4 = vld [vmem:[%s1942_s9 + $0x8] sm:$0xff]  ;;  %v1181_v7 = vld [vmem:[%s1943_s10] sm:$0xff] }
 0x19c   : > { %v719_v11 = vrot.slane %v718_v9, 2  ;;  %v735_v12 = vadd.f32 %v734_v10, %v733_v8  ;;  %v1182_v8 = vld [vmem:[%s1943_s10 + $0x8] sm:$0xff]  ;;  %v1183_v10 = vld [vmem:[%s1943_s10 + $0x10] sm:$0xff] }
 0x19e   : > { %v720_v13 = vadd.f32 %v719_v11, %v718_v9  ;;  %v736_v14 = vrot.slane %v735_v12, 2  ;;  %v1156_v9 = vld [vmem:[%s1942_s9 + $0x18] sm:$0xff] }
 0x19f   : > { %v1184_v11 = vld [vmem:[%s1943_s10 + $0x18] sm:$0xff] }
 0x1a0   : > { %v721_v15 = vrot.slane %v720_v13, 1  ;;  %v737_v16 = vadd.f32 %v736_v14, %v735_v12  ;;  %v1222_v12 = vld [vmem:[#allocation2] sm:$0x1] }
 0x1a2   : > { %v722_v17 = vadd.f32 %v721_v15, %v720_v13  ;;  %v738_v18 = vrot.slane %v737_v16, 1  ;;  %v1515_v15 = vld [vmem:[%s1939_s6 + $0x18] sm:$0xff]  }
 0x1a4   : > { %v739_v19 = vadd.f32 %v738_v18, %v737_v16  ;;  %v740_v20 = vmul.f32 0.03125, %v722_v17  ;;  %v1516_v16 = vld [vmem:[%s1939_s6] sm:$0xff]   ;;  %v1517_v17 = vld [vmem:[%s1939_s6 + $0x8] sm:$0xff]  }
 0x1a5   : > { %v1518_v18 = vld [vmem:[%s1939_s6 + $0x20] sm:$0xff]  }
 0x1a6   : > { %v741_v22 = vmul.f32 0.03125, %v739_v19  ;;  %v742_v23 = vmul.f32 %v740_v20, %v740_v20  ;;  %v746_v24 = vsub.f32 %v706_v53, %v740_v20  ;;  %v748_v25 = vsub.f32 %v708_v52, %v740_v20 }
 0x1a7   : > { %v745_v26 = vsub.f32 %v705_v49, %v740_v20  ;;  %v747_v27 = vsub.f32 %v707_v48, %v740_v20  ;;  %v1514_v48 = vld [vmem:[%s1939_s6 + $0x10] sm:$0xff]   ;;  %v1519_v20 = vld [vmem:[%s1939_s6 + $0x28] sm:$0xff]  }
 0x1a8   : > { %v743_v28 = vsub.f32 %v741_v22, %v742_v23  ;;  %1428 = vmatprep.mubr.msk.bf16.mxu1 %vm476_vm0, %v1514_v48 }
 0x1aa   : > { %v744_v30 = vmax.f32 %v743_v28, 0.0 }
 0x1ac   : > { %v749_v32 = vadd.f32 1e-05, %v744_v30 }
 0x1ae   : > { %1520 = vrsqrt.f32 %v749_v32 }
 0x1b8   : > { %v1521_v36 = vpop.eup %1520 }
 0x1b9   : > { %v752_v38 = vmul.f32 %v1521_v36, %v746_v24  ;;  %v754_v39 = vmul.f32 %v1521_v36, %v748_v25  ;;  %v751_v40 = vmul.f32 %v1521_v36, %v745_v26  ;;  %v753_v41 = vmul.f32 %v1521_v36, %v747_v27 }
 0x1bb   : > { %v780_v42 = vmul.f32 %v767_v29, %v752_v38  ;;  %v782_v43 = vmul.f32 %v777_v35, %v754_v39  ;;  %v779_v44 = vmul.f32 %v762_v21, %v751_v40  ;;  %v781_v45 = vmul.f32 %v772_v34, %v753_v41 }
 0x1bd   : > { %v810_v49 = vadd.f32 %v805_v46, %v782_v43  ;;  %v807_v50 = vadd.f32 %v790_v31, %v779_v44  ;;  %v808_v51 = vadd.f32 %v795_v33, %v780_v42  ;;  %v809_v52 = vadd.f32 %v800_v37, %v781_v45 }
 0x1bf   : > { %v814_v53 = vmul.f32 %v812_v47, %v807_v50  ;;  %v815_v54 = vmul.f32 %v812_v47, %v808_v51  ;;  %v816_v55 = vmul.f32 %v812_v47, %v809_v52  ;;  %v817_v56 = vmul.f32 %v812_v47, %v810_v49 }
 0x1c1   : > { %v818_v57 = vpack.c.bf16 %v815_v54, %v814_v53  ;;  %v819_v58 = vpack.c.bf16 %v817_v56, %v816_v55 }
 0x1c3   : > { %841 = vrot.lane.b32.xlu0 %v818_v57, %s1954_s22  ;;  %843 = vrot.lane.b32.xlu1 %v819_v58, %s1954_s22  ;;  %s1240_s22 = scalar_lea.sflag [#allocation4], %s417_s20 }
 0x1c7   : > { %982 = vrot.lane.b32.xlu0 %v818_v57, %s1955_s18  ;;  %984 = vrot.lane.b32.xlu1 %v819_v58, %s1955_s18 }
 0x1cb   : > { %1053 = vperm.xlu0 %1506, %v1047_v59   ;;  %1058 = vperm.xlu1 %1507, %v1048_v60  }
 0x1cf   : > { %1063 = vperm.xlu0 %1506, %v1049_v61   ;;  %1068 = vperm.xlu1 %1507, %v1050_v62  }
 0x1d3   : > { %1131 = vperm.xlu0 %1506, %v1125_v63   ;;  %1136 = vperm.xlu1 %1507, %v1126_v0  }
 0x1d7   : > { %1141 = vperm.xlu0 %1506, %v1127_v2   ;;  %1159 = vperm.xlu1 %1507, %v1153_v3  }
 0x1db   : > { %1164 = vperm.xlu0 %1506, %v1154_v4   ;;  %1146 = vperm.xlu1 %1507, %v1128_v5  }
 0x1df   : > { %1169 = vperm.xlu0 %1506, %v1155_v6   ;;  %1187 = vperm.xlu1 %1507, %v1181_v7  }
 0x1e3   : > { %1192 = vperm.xlu0 %1506, %v1182_v8   ;;  %1174 = vperm.xlu1 %1507, %v1156_v9  }
 0x1e7   : > { %1197 = vperm.xlu0 %1506, %v1183_v10   ;;  %1202 = vperm.xlu1 %1507, %v1184_v11  }
 0x1eb   : > { %1225 = vperm.xlu0 %1506, %v1222_v12   ;;  %1233 = vrot.lane.b32.xlu1 %v1716_v1, %s1955_s18 }
 0x235   : > { %v842_v13 = vpop.permute.xlu0 %841  ;;  %v844_v14 = vpop.permute.xlu1 %843 }
 0x236   : > { %1424 = vmatprep.subr.bf16.mxu1 %v842_v13 }
 0x237   : > { %1425 = vmatpush3.bf16.msra.mxu1 %v842_v13 }
 0x238   : > { %1426 = vmatprep.subr.bf16.mxu1 %v844_v14 }
 0x239   : > { %v983_v1 = vpop.permute.xlu0 %982  ;;  %v985_v19 = vpop.permute.xlu1 %984 }
 0x23b   : > { %1427 = vmatpush3.bf16.msra.mxu1 %v844_v14 }
 0x23c   : > { %1432 = vmatprep.subr.bf16.mxu1 %v818_v57 }
 0x23e   : > { %1429 = vmatmul.mubr.msk.bf16.vlgmr.msra.gmra.mrb[0].mxu1 %vm476_vm0, %v1515_v15 }
 0x23f   : > { %1433 = vmatpush3.bf16.msra.mxu1 %v818_v57  ;;  %1436 = vmatprep.mubr.msk.bf16.mxu1 %vm476_vm0, %v1516_v16 }
 0x240   : > { %1434 = vmatprep.subr.bf16.mxu1 %v819_v58 }
 0x243   : > { %1435 = vmatpush3.bf16.msra.mxu1 %v819_v58 }
 0x244   : > { %1440 = vmatprep.subr.bf16.mxu1 %v983_v1 }
 0x24a   : > { %1437 = vmatmul.mubr.msk.bf16.vlgmr.msra.gmra.mrb[0].mxu1 %vm476_vm0, %v1517_v17  ;;  %v1054_v21 = vpop.permute.xlu0 %1053  ;;  %v1059_v22 = vpop.permute.xlu1 %1058 }
 0x24b   : > { %1441 = vmatpush3.bf16.msra.mxu1 %v983_v1  ;;  %1444 = vmatprep.mubr.msk.bf16.mxu1 %vm476_vm0, %v1518_v18 }
 0x24c   : > { %1442 = vmatprep.subr.bf16.mxu1 %v985_v19 }
 0x24e   : > { %v1064_v23 = vpop.permute.xlu0 %1063  ;;  %v1069_v27 = vpop.permute.xlu1 %1068 }
 0x24f   : > { %1443 = vmatpush3.bf16.msra.mxu1 %v985_v19 }
 0x252   : > { %v1132_v62 = vpop.permute.xlu0 %1131  ;;  %v1137_v2 = vpop.permute.xlu1 %1136 }
 0x256   : > { %1445 = vmatmul.mubr.msk.bf16.vlgmr.msra.gmra.mrb[0].mxu1 %vm476_vm0, %v1519_v20  ;;  %v1142_v7 = vpop.permute.xlu0 %1141  ;;  %v1160_v14 = vpop.permute.xlu1 %1159 }
 0x25a   : > { %v1165_v1 = vpop.permute.xlu0 %1164  ;;  %v1147_v18 = vpop.permute.xlu1 %1146 }
 0x25e   : > { %v1170_v19 = vpop.permute.xlu0 %1169  ;;  %v1188_v20 = vpop.permute.xlu1 %1187 }
 0x329   : > { %v1446_v24 = vpop.f32.mrb[0].mxu1 }
 0x32a   : > { %v1073_v25 = vadd.f32 %v1446_v24, %v1064_v23  ;;  %v1028_v26 = vpop.f32.mrb[1].mxu1 }
 0x32b   : > { %v1071_v28 = vadd.f32 %v1054_v21, %v1028_v26  ;;  %v1447_v29 = vpop.f32.mrb[2].mxu1 }
 0x32c   : > { %v1074_v30 = vadd.f32 %v1447_v29, %v1069_v27  ;;  %v1031_v31 = vpop.f32.mrb[3].mxu1  ;;  %v1077_v32 = vmax.f32 %v1073_v25, 0.0  ;;  %v1175_v27 = vpop.permute.xlu1 %1174 }
 0x32d   : > { %v1075_v33 = vmax.f32 %v1071_v28, 0.0  ;;  %v1072_v34 = vadd.f32 %v1059_v22, %v1031_v31  ;;  %v1193_v22 = vpop.permute.xlu0 %1192 }
 0x32e   : > { %v1078_v36 = vmax.f32 %v1074_v30, 0.0  ;;  %v1095_v38 = vmul.f32 %v1077_v32, %v1077_v32  ;;  %v1083_v43 = vsel %vm1079_vm2, %v1077_v32, 0.0 }
 0x32f   : > { %v1093_v35 = vmul.f32 %v1075_v33, %v1075_v33  ;;  %v1076_v37 = vmax.f32 %v1072_v34, 0.0  ;;  %v1080_v39 = vsel %vm1079_vm2, %v1075_v33, 0.0 }
 0x330   : > { %v1096_v45 = vmul.f32 %v1078_v36, %v1078_v36  ;;  %v1100_v49 = vsel %vm1079_vm2, %v1095_v38, 0.0  ;;  %v1085_v50 = vsel %vm1079_vm2, %v1078_v36, 0.0 }
 0x331   : > { %v1081_v40 = vsel %vm1079_vm2, %v1076_v37, 0.0  ;;  %v1094_v41 = vmul.f32 %v1076_v37, %v1076_v37  ;;  %v1097_v44 = vsel %vm1079_vm2, %v1093_v35, 0.0 }
 0x332   : > { %v1082_v42 = vadd.f32 %v1081_v40, %v1080_v39  ;;  %v1102_v53 = vsel %vm1079_vm2, %v1096_v45, 0.0  ;;  %v1203_v40 = vpop.permute.xlu1 %1202 }
 0x333   : > { %v1098_v46 = vsel %vm1079_vm2, %v1094_v41, 0.0 }
 0x334   : > { %v1084_v47 = vadd.f32 %v1083_v43, %v1082_v42  ;;  %v1099_v48 = vadd.f32 %v1098_v46, %v1097_v44 }
 0x336   : > { %v1086_v51 = vadd.f32 %v1085_v50, %v1084_v47  ;;  %v1101_v52 = vadd.f32 %v1100_v49, %v1099_v48  ;;  %v1228_v48 = vlaneseq }
 0x338   : > { %v1087_v54 = vrot.slane %v1086_v51, 4  ;;  %v1103_v55 = vadd.f32 %v1102_v53, %v1101_v52 }
 0x33a   : > { %v1088_v56 = vadd.f32 %v1087_v54, %v1086_v51  ;;  %v1104_v57 = vrot.slane %v1103_v55, 4  ;;  %v1229_v51 = vshrl.u32 %v1228_v48, 7 }
 0x33c   : > { %v1089_v58 = vrot.slane %v1088_v56, 2  ;;  %v1105_v59 = vadd.f32 %v1104_v57, %v1103_v55  ;;  %v1230_v54 = vsub.s32 0, %v1229_v51 }
 0x33e   : > { %v1090_v60 = vadd.f32 %v1089_v58, %v1088_v56  ;;  %v1106_v61 = vrot.slane %v1105_v59, 2 }
 0x340   : > { %v1091_v63 = vrot.slane %v1090_v60, 1  ;;  %v1107_v0 = vadd.f32 %v1106_v61, %v1105_v59 }
 0x342   : > { %v1092_v3 = vadd.f32 %v1091_v63, %v1090_v60  ;;  %v1108_v4 = vrot.slane %v1107_v0, 1  ;;  %v1234_v60 = vpop.permute.xlu1 %1233 }
 0x344   : > { %v1109_v5 = vadd.f32 %v1108_v4, %v1107_v0  ;;  %v1110_v6 = vmul.f32 0.03125, %v1092_v3 }
 0x346   : > { %v1111_v8 = vmul.f32 0.03125, %v1109_v5  ;;  %v1112_v9 = vmul.f32 %v1110_v6, %v1110_v6  ;;  %v1116_v10 = vsub.f32 %v1076_v37, %v1110_v6  ;;  %v1115_v11 = vsub.f32 %v1075_v33, %v1110_v6 }
 0x347   : > { %v1117_v12 = vsub.f32 %v1077_v32, %v1110_v6  ;;  %v1118_v13 = vsub.f32 %v1078_v36, %v1110_v6  ;;  %v1198_v36 = vpop.permute.xlu0 %1197 }
 0x348   : > { %v1113_v15 = vsub.f32 %v1111_v8, %v1112_v9 }
 0x34a   : > { %v1114_v16 = vmax.f32 %v1113_v15, 0.0 }
 0x34b   : > { %v1226_v56 = vpop.permute.xlu0 %1225 }
 0x34c   : > { %v1119_v17 = vadd.f32 1e-05, %v1114_v16  ;;  %v1231_v58 = vrot.slane %v1226_v56, %v1230_v54 }
 0x34e   : > { %1522 = vrsqrt.f32 %v1119_v17 }
 0x358   : > { %v1523_v21 = vpop.eup %1522 }
 0x359   : > { %v1122_v23 = vmul.f32 %v1523_v21, %v1116_v10  ;;  %v1121_v24 = vmul.f32 %v1523_v21, %v1115_v11  ;;  %v1123_v25 = vmul.f32 %v1523_v21, %v1117_v12  ;;  %v1124_v26 = vmul.f32 %v1523_v21, %v1118_v13 }
 0x35b   : > { %v1150_v28 = vmul.f32 %v1137_v2, %v1122_v23  ;;  %v1149_v29 = vmul.f32 %v1132_v62, %v1121_v24  ;;  %v1151_v30 = vmul.f32 %v1142_v7, %v1123_v25  ;;  %v1152_v31 = vmul.f32 %v1147_v18, %v1124_v26 }
 0x35d   : > { %v1178_v32 = vadd.f32 %v1165_v1, %v1150_v28  ;;  %v1177_v33 = vadd.f32 %v1160_v14, %v1149_v29  ;;  %v1179_v34 = vadd.f32 %v1170_v19, %v1151_v30  ;;  %v1180_v35 = vadd.f32 %v1175_v27, %v1152_v31 }
 0x35f   : > { %v1206_v37 = vmul.f32 %v1193_v22, %v1178_v32  ;;  %v1205_v38 = vmul.f32 %v1188_v20, %v1177_v33  ;;  %v1207_v39 = vmul.f32 %v1198_v36, %v1179_v34  ;;  %v1208_v41 = vmul.f32 %v1203_v40, %v1180_v35 }
 0x361   : > { %v1209_v42 = vsel %vm1079_vm2, %v1205_v38, 0.0  ;;  %v1210_v43 = vsel %vm1079_vm2, %v1206_v37, 0.0  ;;  %v1212_v45 = vsel %vm1079_vm2, %v1207_v39, 0.0  ;;  %v1214_v47 = vsel %vm1079_vm2, %v1208_v41, 0.0 }
 0x362   : > { %v1211_v44 = vadd.f32 %v1210_v43, %v1209_v42 }
 0x364   : > { %v1213_v46 = vadd.f32 %v1212_v45, %v1211_v44 }
 0x366   : > { %v1215_v49 = vadd.f32 %v1214_v47, %v1213_v46 }
 0x368   : > { %v1216_v50 = vrot.slane %v1215_v49, 4 }
 0x36a   : > { %v1217_v52 = vadd.f32 %v1216_v50, %v1215_v49 }
 0x36c   : > { %v1218_v53 = vrot.slane %v1217_v52, 2 }
 0x36e   : > { %v1219_v55 = vadd.f32 %v1218_v53, %v1217_v52 }
 0x370   : > { %v1220_v57 = vrot.slane %v1219_v55, 1 }
 0x372   : > { %v1221_v59 = vadd.f32 %v1220_v57, %v1219_v55 }
 0x374   : > { %v1232_v61 = vadd.f32 %v1231_v58, %v1221_v59 }
 0x376   : > { %v1236_v62 = vmul.f32 %v1234_v60, %v1232_v61 }
 0x378   : > { %1238 = vst.msk [vmem:[%s418_s16] sm:$0x1] %vm1237_vm3, %v1236_v62 }
 0x379   : > { %1537 = shalt.err (!%p1534_p3)
}
 0x37a   : > { %s1538_s20 = scalar_lea.hbm %s1891_s29, 16  ;;  %s1542_s27 = scalar_lea.hbm %s1945_s12, 32 }
 0x37b   : > { %p1539_p4 = scmp.ne.s32.totalorder %s1891_s29, %s1538_s20  ;;  %p1543_p9 = scmp.lt.u32.totalorder %s1891_s29, %s1945_s12 }
 0x37c   : > { %p1544_p10 = scmp.lt.u32.totalorder %s1542_s27, %s1538_s20  ;;  %p1546_p12 = scmp.lt.u32.totalorder %s1538_s20, %s1891_s29 }
 0x37d   : > { %p1540_p7 = pnand %p1539_p4, %p1698_p5 }
 0x37e   : > { %p1545_p11 = por %p1544_p10, %p1543_p9 }
 0x37f   : > { %p1541_p8 = pneg %p1540_p7 }
 0x380   : > { %p1547_p13 = por %p1546_p12, %p1545_p11 }
 0x382   : > { %p1548_p0 = pnand %p1547_p13, %p1541_p8 }
 0x384   : > { %1551 = shalt.err (!%p1548_p0)
}
 0x385   : > { %1464 = dma.vmem_to_hbm [thread:$0]  (%p1698_p5), %s1893_s17, 16, %s1891_s29, %s1240_s22  }
 0x386 PF: > { %p1470_p1 = scmp.ge.s32.totalorder %s1586_s26, 2  ;;  %s1264_s0 = sand.u32 1, %s1574_s23  }
 0x387   : > { %s1265_s30 = scalar_lea.sflag [#allocation4], %s1264_s0 }
 0x388   : > { %p1467_p2 = pnand %p1470_p1, %p1702_p6 }
 0x38a   : > { %1569 = dma.done.wait (!%p1467_p2), %s1265_s30, 16  }
 0x38b   : > { %1571 = vsyncadd (!%p1467_p2), %s1265_s30, 4294967280  ;;  %p24_p3 = scmp.ge.s32.totalorder %s1685_s28, 4   ;;  %s1956_s23 = smov %s1578_s24 }
 0x38c   : > { %s1957_s24 = smov %s1582_s25  ;;  %s1958_s25 = smov %s1696_s13 }
 0x38d   : > { %s1959_s26 = smov %s1685_s28  ;;  %26 = sbr.rel (!%p24_p3) target bundleno = 6 (0x6), region = 110 }
 0x394   :  { %1269 = vsyncpa [#allocation4], 1 }
 0x395   :  { %1271 = vsyncpa [#allocation4 + $0x1], 1 }

</bundles_post_ra>
